<compile_context>
chip_gen: v6e
topology: v6e:2x2x1
jax: 0.10.0
libtpu: 0.0.40
codegen_flags: <defaults>
</compile_context>

<pallas_src>
import functools

import jax
import jax.numpy as jnp
from jax.experimental import pallas as pl
from jax.experimental.pallas import tpu as pltpu

HIDDEN = 128


def denoiser_kernel(xt_ref, c_ref, w2t_ref, w3t_ref, b3_ref, o_ref, *, bf16_act):
    # xt: (2, tn) f32        c: (128, 4) f32 = [w1x | w1t | b1 | b2]
    # w2t: (128, 128) bf16   w3t: (1, 128) f32   b3 (SMEM): (1,)   o: (1, tn) f32
    xt = xt_ref[...]
    x = xt[0:1, :]                       # (1, tn)
    t = xt[1:2, :]                       # (1, tn)

    c = c_ref[...]                       # (128, 4)
    w1x, w1t, b1c, b2c = c[:, 0:1], c[:, 1:2], c[:, 2:3], c[:, 3:4]

    act_dtype = jnp.bfloat16 if bf16_act else jnp.float32

    # Layer 1 on the VPU: h1[f, n] = tanh(w1[0,f]*x[n] + w1[1,f]*t[n] + b1[f]).
    h1_pre = w1x * x + w1t * t + b1c                               # (128, tn) f32
    h1 = jnp.tanh(h1_pre.astype(act_dtype))                        # EUP

    # Layer 2: the only real matmul (K=128), bf16 operands, f32 accumulation.
    h2_pre = jnp.dot(w2t_ref[...], h1.astype(w2t_ref.dtype),
                     preferred_element_type=jnp.float32) + b2c     # (128, tn) f32
    h2 = jnp.tanh(h2_pre.astype(act_dtype))                        # EUP

    # Dropout(p) in eval mode is identity; residual add then layer 3 as a
    # (1,128) @ (128,tn) matmul -> lane-dense output row. Layer 3 kept in f32
    # (0.8% of FLOPs, keeps the final reduction accurate).
    r = h1.astype(jnp.float32) + h2.astype(jnp.float32)
    y = jnp.dot(w3t_ref[...], r, preferred_element_type=jnp.float32) + b3_ref[0]
    o_ref[...] = y.astype(o_ref.dtype)


def _device_kind():
    try:
        return jax.devices()[0].device_kind.lower()
    except Exception:  # pragma: no cover - defensive, e.g. interpret mode
        return ""


def _pick_tile(n, cap, min_steps):
    """Largest multiple of 128 dividing n, <= cap, giving >= min_steps steps."""
    k = n // 128
    best = None
    for g in range(1, k + 1):
        if k % g != 0:
            continue
        if 128 * g > cap:
            break
        if (k // g) >= min_steps:
            best = g
    if best is None:  # e.g. n == 128 but min_steps == 2: fall back to one step
        for g in range(1, k + 1):
            if k % g == 0 and 128 * g <= cap:
                best = g
    return 128 * best


def denoiser_forward(x, t, params, *, tile_n=8192, bf16_activations=None):
    """x, t: (N,) float32, N a multiple of 128. Returns (N,) float32, matching
    DenoiserANN.forward(x, t).squeeze(-1) in eval mode."""
    w1, b1, w2, b2, w3, b3 = params
    N = x.shape[0]
    assert N % 128 == 0, "pad the batch to a multiple of 128"
    assert tile_n >= 128

    kind = _device_kind()
    is_v7x = ("v7" in kind) or ("tpu7" in kind)
    if bf16_activations is None:
        # bf16 EUP/VPU exist on v6e/v7x; on v5e keep f32 activations.
        bf16_activations = any(s in kind for s in ("v6", "v7", "tpu7"))

    # Only v7x (2 TensorCores, dimension_semantics="parallel") benefits from
    # forcing >= 2 grid steps; on v5e/v6e the grid is a serial loop.
    min_steps = 2 if (is_v7x and N >= 256) else 1
    tn = _pick_tile(N, cap=min(tile_n, N), min_steps=min_steps)
    grid = (N // tn,)

    # Layout plumbing (glue): batch -> lanes, features -> sublanes.
    xt_rows = jnp.stack([x, t], axis=0).astype(jnp.float32)           # (2, N)
    consts = jnp.stack(
        [w1[0, :], w1[1, :], b1.reshape(-1), b2.reshape(-1)], axis=1
    ).astype(jnp.float32)                                             # (128, 4)
    w2t = w2.T.astype(jnp.bfloat16)                                   # (128, 128)
    w3t = w3.reshape(1, HIDDEN).astype(jnp.float32)                   # (1, 128)
    b3s = b3.reshape(1).astype(jnp.float32)                           # SMEM scalar

    const = lambda i: (0, 0)
    kernel = functools.partial(denoiser_kernel, bf16_act=bool(bf16_activations))

    out = pl.pallas_call(
        kernel,
        out_shape=jax.ShapeDtypeStruct((1, N), jnp.float32),
        grid_spec=pltpu.PrefetchScalarGridSpec(
            num_scalar_prefetch=0,
            grid=grid,
            in_specs=[
                pl.BlockSpec((2, tn), lambda i: (0, i)),                 # x|t rows
                pl.BlockSpec((HIDDEN, 4), const),                        # w1x|w1t|b1|b2
                pl.BlockSpec((HIDDEN, HIDDEN), const),                   # w2^T (bf16)
                pl.BlockSpec((1, HIDDEN), const),                        # w3^T
                pl.BlockSpec(memory_space=pltpu.MemorySpace.SMEM),       # b3 scalar
            ],
            out_specs=pl.BlockSpec((1, tn), lambda i: (0, i)),           # lane-dense
        ),
        compiler_params=pltpu.CompilerParams(
            dimension_semantics=("parallel",),
            vmem_limit_bytes=32 * 1024 * 1024,   # big tiles fit v5e's scoped VMEM too
        ),
    )(xt_rows, consts, w2t, w3t, b3s)
    return out[0]  # squeeze(-1)


def init_params(key):
    """Deterministic init mimicking nn.Linear's U(-1/sqrt(fan_in), 1/sqrt(fan_in))."""
    ks = jax.random.split(key, 6)

    def lin(kw, kb, fan_in, fan_out):
        bound = 1.0 / jnp.sqrt(jnp.float32(fan_in))
        w = jax.random.uniform(kw, (fan_in, fan_out), jnp.float32, -bound, bound)
        b = jax.random.uniform(kb, (1, fan_out), jnp.float32, -bound, bound)
        return w, b

    w1, b1 = lin(ks[0], ks[1], 2, HIDDEN)
    w2, b2 = lin(ks[2], ks[3], HIDDEN, HIDDEN)
    w3, b3 = lin(ks[4], ks[5], HIDDEN, 1)
    return (w1, b1, w2, b2, w3, b3)


def reference_forward(x, t, params):
    w1, b1, w2, b2, w3, b3 = params
    xt = jnp.stack([x, t], axis=-1)
    h1 = jnp.tanh(xt @ w1 + b1)
    h2 = jnp.tanh(h1 @ w2 + b2)
    return ((h1 + h2) @ w3 + b3)[:, 0]


if __name__ == "__main__":
    key = jax.random.PRNGKey(0)
    kp, kx, kt = jax.random.split(key, 3)

    N = 256  # small batch of scalar (x, t) samples (multiple of 128)
    params = init_params(kp)
    x = jax.random.normal(kx, (N,), jnp.float32)
    t = jax.random.uniform(kt, (N,), jnp.float32)

    out = denoiser_forward(x, t, params)
    out = jax.block_until_ready(out)

    ref = reference_forward(x, t, params)
    assert out.shape == (N,)
    # bf16 MXU operands (and bf16 tanh on v6e/v7x) relax the match vs f32 ref.
    assert jnp.allclose(out, ref, atol=2e-2, rtol=2e-2), (
        float(jnp.max(jnp.abs(out - ref)))
    )
    print("KERNEL_OK")
</pallas_src>

<mosaic_0001>
module attributes {stable_mosaic.version = 11 : i64} {
  func.func @denoiser_kernel(%arg0: i32, %arg1: memref<2x256xf32, #tpu.memory_space<vmem>>, %arg2: memref<128x4xf32, #tpu.memory_space<vmem>>, %arg3: memref<128x128xbf16, #tpu.memory_space<vmem>>, %arg4: memref<1x128xf32, #tpu.memory_space<vmem>>, %arg5: memref<1xf32, #tpu.memory_space<smem>>, %arg6: memref<1x256xf32, #tpu.memory_space<vmem>>) attributes {dimension_semantics = [#tpu.dimension_semantics<parallel>], iteration_bounds = array<i64: 1>, scalar_prefetch = 0 : i64, scratch_operands = 0 : i64, tpu.core_type = #tpu.core_type<tc>, window_params = [{transform_indices = @transform_0, window_bounds = array<i64: 2, 256>}, {pipeline_mode = #tpu.pipeline_mode<synchronous>, transform_indices = @transform_1, window_bounds = array<i64: 128, 4>}, {pipeline_mode = #tpu.pipeline_mode<synchronous>, transform_indices = @transform_2, window_bounds = array<i64: 128, 128>}, {pipeline_mode = #tpu.pipeline_mode<synchronous>, transform_indices = @transform_3, window_bounds = array<i64: 1, 128>}, {transform_indices = @transform_4, window_bounds = array<i64: 1>}, {transform_indices = @transform_5, window_bounds = array<i64: 1, 256>}]} {
    %c0 = arith.constant 0 : index
    %c0_0 = arith.constant 0 : index
    %0 = vector.load %arg1[%c0, %c0_0] : memref<2x256xf32, #tpu.memory_space<vmem>>, vector<2x256xf32>
    %1 = vector.extract_strided_slice %0 {offsets = [0, 0], sizes = [1, 256], strides = [1, 1]} : vector<2x256xf32> to vector<1x256xf32>
    %2 = vector.extract_strided_slice %0 {offsets = [1, 0], sizes = [1, 256], strides = [1, 1]} : vector<2x256xf32> to vector<1x256xf32>
    %c0_1 = arith.constant 0 : index
    %c0_2 = arith.constant 0 : index
    %3 = vector.load %arg2[%c0_1, %c0_2] : memref<128x4xf32, #tpu.memory_space<vmem>>, vector<128x4xf32>
    %4 = vector.extract_strided_slice %3 {offsets = [0, 0], sizes = [128, 1], strides = [1, 1]} : vector<128x4xf32> to vector<128x1xf32>
    %5 = vector.extract_strided_slice %3 {offsets = [0, 1], sizes = [128, 1], strides = [1, 1]} : vector<128x4xf32> to vector<128x1xf32>
    %6 = vector.extract_strided_slice %3 {offsets = [0, 2], sizes = [128, 1], strides = [1, 1]} : vector<128x4xf32> to vector<128x1xf32>
    %7 = vector.extract_strided_slice %3 {offsets = [0, 3], sizes = [128, 1], strides = [1, 1]} : vector<128x4xf32> to vector<128x1xf32>
    %8 = vector.broadcast %4 : vector<128x1xf32> to vector<128x256xf32>
    %9 = vector.broadcast %1 : vector<1x256xf32> to vector<128x256xf32>
    %10 = arith.mulf %8, %9 : vector<128x256xf32>
    %11 = vector.broadcast %5 : vector<128x1xf32> to vector<128x256xf32>
    %12 = vector.broadcast %2 : vector<1x256xf32> to vector<128x256xf32>
    %13 = arith.mulf %11, %12 : vector<128x256xf32>
    %14 = arith.addf %10, %13 : vector<128x256xf32>
    %15 = vector.broadcast %6 : vector<128x1xf32> to vector<128x256xf32>
    %16 = arith.addf %14, %15 : vector<128x256xf32>
    %17 = math.tanh %16 : vector<128x256xf32>
    %c0_3 = arith.constant 0 : index
    %c0_4 = arith.constant 0 : index
    %18 = vector.load %arg3[%c0_3, %c0_4] : memref<128x128xbf16, #tpu.memory_space<vmem>>, vector<128x128xbf16>
    %19 = arith.truncf %17 : vector<128x256xf32> to vector<128x256xbf16>
    %cst = arith.constant dense<0.000000e+00> : vector<128x256xf32>
    %20 = tpu.matmul %18, %19, %cst {dimension_numbers = #tpu.dot_dimension_numbers<[1], [0], [0], [1], [0, 0, 1, 1], [], []>} : vector<128x128xbf16>, vector<128x256xbf16>, vector<128x256xf32> -> vector<128x256xf32>
    %21 = vector.broadcast %7 : vector<128x1xf32> to vector<128x256xf32>
    %22 = arith.addf %20, %21 : vector<128x256xf32>
    %23 = math.tanh %22 : vector<128x256xf32>
    %24 = arith.addf %17, %23 : vector<128x256xf32>
    %c0_5 = arith.constant 0 : index
    %c0_6 = arith.constant 0 : index
    %25 = vector.load %arg4[%c0_5, %c0_6] : memref<1x128xf32, #tpu.memory_space<vmem>>, vector<1x128xf32>
    %cst_7 = arith.constant dense<0.000000e+00> : vector<1x256xf32>
    %26 = tpu.matmul %25, %24, %cst_7 {dimension_numbers = #tpu.dot_dimension_numbers<[1], [0], [0], [1], [0, 0, 1, 1], [], []>} : vector<1x128xf32>, vector<128x256xf32>, vector<1x256xf32> -> vector<1x256xf32>
    %c0_8 = arith.constant 0 : index
    %27 = memref.load %arg5[%c0_8] : memref<1xf32, #tpu.memory_space<smem>>
    %28 = vector.broadcast %27 : f32 to vector<1x256xf32>
    %29 = arith.addf %26, %28 : vector<1x256xf32>
    %c0_9 = arith.constant 0 : index
    %c0_10 = arith.constant 0 : index
    %30 = vector.load %arg6[%c0_9, %c0_10] : memref<1x256xf32, #tpu.memory_space<vmem>>, vector<1x256xf32>
    tpu.vector_store %arg6[%c0_9, %c0_10], %29 {strides = array<i32>} : memref<1x256xf32, #tpu.memory_space<vmem>>, vector<1x256xf32>,
    return
  }
  func.func @transform_0(%arg0: i32) -> (i32, i32) {
    %c0_i32 = arith.constant 0 : i32
    %c0_i32_0 = arith.constant 0 : i32
    return %c0_i32, %arg0 : i32, i32
  }
  func.func @transform_1(%arg0: i32) -> (i32, i32) {
    %c0_i32 = arith.constant 0 : i32
    %c0_i32_0 = arith.constant 0 : i32
    %c0_i32_1 = arith.constant 0 : i32
    return %c0_i32, %c0_i32_0 : i32, i32
  }
  func.func @transform_2(%arg0: i32) -> (i32, i32) {
    %c0_i32 = arith.constant 0 : i32
    %c0_i32_0 = arith.constant 0 : i32
    %c0_i32_1 = arith.constant 0 : i32
    return %c0_i32, %c0_i32_0 : i32, i32
  }
  func.func @transform_3(%arg0: i32) -> (i32, i32) {
    %c0_i32 = arith.constant 0 : i32
    %c0_i32_0 = arith.constant 0 : i32
    %c0_i32_1 = arith.constant 0 : i32
    return %c0_i32, %c0_i32_0 : i32, i32
  }
  func.func @transform_4(%arg0: i32) -> i32 {
    %c0_i32 = arith.constant 0 : i32
    %c0_i32_0 = arith.constant 0 : i32
    return %c0_i32 : i32
  }
  func.func @transform_5(%arg0: i32) -> (i32, i32) {
    %c0_i32 = arith.constant 0 : i32
    %c0_i32_0 = arith.constant 0 : i32
    return %c0_i32, %arg0 : i32, i32
  }
}

</mosaic_0001>

<bundles_post_ra>
// kernel: tpu_custom_call.1
= control target key start
LH: loop header
LB: loop body
LE: loop exit
PB: predicated region body
PF: predicated region fallthrough
CT: control target
= control target key end

     0   :  { %v1093_v1 = vmov 1   ;;  %v1094_v2 = vmov 0   ;;  %s1627_s0 = inlined_call_operand.vmem [shape: f32[2,256], index: 0, kind: input, shape index: {}]   ;;  %s1628_s1 = inlined_call_operand.vmem [shape: f32[128,4], index: 1, kind: input, shape index: {}]   ;;  %s1629_s2 = inlined_call_operand.vmem [shape: bf16[128,128], index: 2, kind: input, shape index: {}]   ;;  %s1630_s3 = inlined_call_operand.vmem [shape: f32[1,128], index: 3, kind: input, shape index: {}]   ;;  %s1631_s4 = inlined_call_operand.<no memory space> [shape: f32[1], index: 4, kind: input, shape index: {}]   ;;  %s1632_s5 = inlined_call_operand.hbm [shape: f32[1,256], index: 5, kind: output, shape index: {}]  }
   0x1   :  { %v1133_v0 = vld [vmem:[%s1628_s1 + $0x70] sm:$0xff]  ;;  %909 = vset.pattern.permute.xlu1 %v1093_v1  ;;  %908 = vset.pattern.permute.xlu0 %v1094_v2  ;;  %v1142_v3 = vld [vmem:[%s1628_s1 + $0x78] sm:$0xff]  ;;  %v1149_v4 = vld [vmem:[%s1628_s1 + $0x60] sm:$0xff] }
   0x2   :  { %228 = vperm.xlu1 %909, %v1133_v0   ;;  %112 = vperm.xlu0 %908, %v1133_v0   ;;  %v1156_v5 = vld [vmem:[%s1628_s1 + $0x68] sm:$0xff] }
   0x3   :  { %621 = vmatprep.mubr.bf16.mxu0 %v1094_v2  ;;  %661 = vmatprep.mubr.bf16.mxu1 %v1094_v2 }
   0x6   :  { %232 = vperm.xlu1 %909, %v1142_v3   ;;  %117 = vperm.xlu0 %908, %v1142_v3  }
   0xa   :  { %910 = vset.pattern.permute.xlu1 %v1094_v2  ;;  %102 = vperm.xlu0 %908, %v1149_v4  }
   0xb   :  { %107 = vperm.xlu1 %910, %v1156_v5  }
   0xc   :  { %11 = vsyncpa [#allocation4], 0  ;;  %v1168_v6 = vld [vmem:[%s1628_s1 + $0x50] sm:$0xff]  ;;  %v1095_v7 = vmov 2   ;;  %v1175_v8 = vld [vmem:[%s1628_s1 + $0x40] sm:$0xff]  ;;  %v1633_v25 = vlaneseq  ;;  %s1099_s19 = smov [#allocation3]  }
   0xd   :  { %v1182_v9 = vld [vmem:[%s1628_s1 + $0x30] sm:$0xff]  ;;  %v1190_v10 = vld [vmem:[%s1628_s1 + $0x58] sm:$0xff]  ;;  %v1195_v11 = vld [vmem:[%s1628_s1 + $0x20] sm:$0xff]  ;;  %s869_s20 = sshll.u32 %s1099_s19, 4  ;;  %s870_s20 = int_to_ptr.vmem [resolvable:$true] %s869_s20 }
   0xe   :  { %911 = vset.pattern.permute.xlu0 %v1093_v1  ;;  %v1202_v12 = vld [vmem:[%s1628_s1 + $0x10] sm:$0xff]  ;;  %v1210_v13 = vld [vmem:[%s1628_s1] sm:$0xff]  ;;  %v1222_v14 = vld [vmem:[%s1628_s1 + $0x48] sm:$0xff]  ;;  %v1285_v28 = vshrl.u32 %v1633_v25, 7  ;;  %p1076_p1 = scmp.lt.s32.totalorder %s870_s20, %s870_s20 }
   0xf   :  { %912 = vset.pattern.permute.xlu1 %v1093_v1  ;;  %220 = vperm.xlu0 %911, %v1149_v4   ;;  %v1235_v15 = vld [vmem:[%s1628_s1 + $0x38] sm:$0xff]  ;;  %v1242_v16 = vld [vmem:[%s1628_s1 + $0x28] sm:$0xff]  ;;  %v23_v33 = vld [vmem:[%s1627_s0] sm:$0xf] }
  0x10   :  { %224 = vperm.xlu1 %912, %v1156_v5   ;;  %v1249_v17 = vld [vmem:[%s1628_s1 + $0x18] sm:$0xff]  ;;  %v1276_v18 = vld [vmem:[%s1628_s1 + $0x8] sm:$0xff]  ;;  %1653 = vst [vmem:[#allocation6_spill] sm:$0xff] %v1285_v28  ;;  %v237_v31 = vsub.s32 1, %v1285_v28  ;;  %v123_v32 = vsub.s32 0, %v1285_v28  ;;  %v241_v35 = vsub.s32 3, %v1285_v28 }
  0x11   :  { %v127_v36 = vsub.s32 2, %v1285_v28 }
  0x12   :  { %v238_v37 = vrot.slane %v23_v33, %v237_v31  ;;  %v124_v38 = vrot.slane %v23_v33, %v123_v32  ;;  %v242_v41 = vrot.slane %v23_v33, %v241_v35 }
  0x13   :  { %212 = vperm.xlu0 %911, %v1168_v6   ;;  %v128_v42 = vrot.slane %v23_v33, %v127_v36 }
  0x14   :  { %913 = vset.pattern.permute.xlu1 %v1095_v7  ;;  %v1303_v43 = vrot.slane %v238_v37, %v237_v31  ;;  %v1305_v44 = vrot.slane %v124_v38, %v123_v32  ;;  %v1309_v47 = vrot.slane %v242_v41, %v237_v31 }
  0x15   :  { %374 = vperm.xlu1 %913, %v1133_v0   ;;  %v1311_v48 = vrot.slane %v128_v42, %v123_v32 }
  0x17   :  { %204 = vperm.xlu0 %911, %v1175_v8  }
  0x19   :  { %914 = vset.pattern.permute.xlu1 %v1094_v2 }
  0x1a   :  { %92 = vperm.xlu1 %914, %v1168_v6  }
  0x1b   :  { %196 = vperm.xlu0 %911, %v1182_v9  }
  0x1e   :  { %97 = vperm.xlu1 %914, %v1190_v10  }
  0x1f   :  { %188 = vperm.xlu0 %911, %v1195_v11  }
  0x22   :  { %915 = vset.pattern.permute.xlu1 %v1093_v1 }
  0x23   :  { %216 = vperm.xlu1 %915, %v1190_v10   ;;  %180 = vperm.xlu0 %911, %v1202_v12  }
  0x27   :  { %916 = vset.pattern.permute.xlu1 %v1095_v7  ;;  %172 = vperm.xlu0 %911, %v1210_v13  }
  0x28   :  { %366 = vperm.xlu1 %916, %v1149_v4  }
  0x2b   :  { %930 = vset.pattern.permute.xlu0 %v1095_v7 }
  0x2c   :  { %917 = vset.pattern.permute.xlu1 %v1094_v2  ;;  %378 = vperm.xlu0 %930, %v1142_v3  }
  0x2d   :  { %82 = vperm.xlu1 %917, %v1175_v8  }
  0x30   :  { %370 = vperm.xlu0 %930, %v1156_v5  }
  0x31   :  { %87 = vperm.xlu1 %917, %v1222_v14  }
  0x34   :  { %362 = vperm.xlu0 %930, %v1190_v10  }
  0x35   :  { %918 = vset.pattern.permute.xlu1 %v1093_v1 }
  0x36   :  { %208 = vperm.xlu1 %918, %v1222_v14  }
  0x38   :  { %354 = vperm.xlu0 %930, %v1222_v14  }
  0x3a   :  { %919 = vset.pattern.permute.xlu1 %v1095_v7 }
  0x3b   :  { %358 = vperm.xlu1 %919, %v1168_v6  }
  0x3c   :  { %346 = vperm.xlu0 %930, %v1235_v15  }
  0x3f   :  { %920 = vset.pattern.permute.xlu1 %v1094_v2 }
  0x40   :  { %72 = vperm.xlu1 %920, %v1182_v9   ;;  %338 = vperm.xlu0 %930, %v1242_v16  }
  0x44   :  { %77 = vperm.xlu1 %920, %v1235_v15   ;;  %330 = vperm.xlu0 %930, %v1249_v17  }
  0x48   :  { %921 = vset.pattern.permute.xlu1 %v1093_v1 }
  0x49   :  { %200 = vperm.xlu1 %921, %v1235_v15  }
  0x4d   :  { %922 = vset.pattern.permute.xlu1 %v1095_v7 }
  0x4e   :  { %350 = vperm.xlu1 %922, %v1175_v8  }
  0x52   :  { %923 = vset.pattern.permute.xlu1 %v1094_v2 }
  0x53   :  { %62 = vperm.xlu1 %923, %v1195_v11  }
  0x57   :  { %67 = vperm.xlu1 %923, %v1242_v16  }
  0x5b   :  { %924 = vset.pattern.permute.xlu1 %v1093_v1 }
  0x5c   :  { %192 = vperm.xlu1 %924, %v1242_v16  }
  0x60   :  { %925 = vset.pattern.permute.xlu1 %v1095_v7 }
  0x61   :  { %342 = vperm.xlu1 %925, %v1182_v9  }
  0x65   :  { %926 = vset.pattern.permute.xlu1 %v1094_v2 }
  0x66   :  { %52 = vperm.xlu1 %926, %v1202_v12  }
  0x6a   :  { %57 = vperm.xlu1 %926, %v1249_v17  }
  0x6e   :  { %927 = vset.pattern.permute.xlu1 %v1093_v1 }
  0x6f   :  { %184 = vperm.xlu1 %927, %v1249_v17  }
  0x73   :  { %928 = vset.pattern.permute.xlu1 %v1095_v7 }
  0x74   :  { %334 = vperm.xlu1 %928, %v1195_v11  }
  0x78   :  { %929 = vset.pattern.permute.xlu1 %v1094_v2 }
  0x79   :  { %42 = vperm.xlu1 %929, %v1210_v13  }
  0x7d   :  { %v229_v19 = vpop.permute.xlu1 %228  ;;  %v113_v20 = vpop.permute.xlu0 %112  ;;  %47 = vperm.xlu1 %929, %v1276_v18  }
  0x7e   :  { %v281_v49 = vmul.f32 %v1303_v43, %v229_v19  ;;  %v167_v50 = vmul.f32 %v1305_v44, %v113_v20  ;;  %v282_v53 = vmul.f32 %v1309_v47, %v229_v19  ;;  %v168_v54 = vmul.f32 %v1311_v48, %v113_v20 }
  0x80   :  { %v313_v59 = vadd.f32 %v281_v49, %v167_v50 }
  0x81   :  { %v233_v21 = vpop.permute.xlu1 %232  ;;  %v118_v22 = vpop.permute.xlu0 %117  ;;  %931 = vset.pattern.permute.xlu1 %v1093_v1 }
  0x82   :  { %176 = vperm.xlu1 %931, %v1276_v18   ;;  %v283_v60 = vmul.f32 %v1303_v43, %v233_v21  ;;  %v284_v61 = vmul.f32 %v1309_v47, %v233_v21  ;;  %v169_v62 = vmul.f32 %v1305_v44, %v118_v22  ;;  %v170_v63 = vmul.f32 %v1311_v48, %v118_v22 }
  0x84   :  { %v315_v35 = vadd.f32 %v283_v60, %v169_v62  ;;  %v316_v36 = vadd.f32 %v284_v61, %v170_v63 }
  0x85   :  { %v103_v23 = vpop.permute.xlu0 %102 }
  0x86   :  { %v108_v24 = vpop.permute.xlu1 %107  ;;  %932 = vset.pattern.permute.xlu1 %v1095_v7  ;;  %v163_v55 = vmul.f32 %v1305_v44, %v103_v23  ;;  %v164_v57 = vmul.f32 %v1311_v48, %v103_v23  ;;  %v314_v7 = vadd.f32 %v282_v53, %v168_v54 }
  0x87   :  { %326 = vperm.xlu1 %932, %v1202_v12   ;;  %v165_v21 = vmul.f32 %v1305_v44, %v108_v24  ;;  %v166_v37 = vmul.f32 %v1311_v48, %v108_v24 }
  0x8a   :  { %v221_v26 = vpop.permute.xlu0 %220 }
  0x8b   :  { %v225_v27 = vpop.permute.xlu1 %224  ;;  %318 = vperm.xlu1 %932, %v1210_v13   ;;  %v277_v56 = vmul.f32 %v1303_v43, %v221_v26  ;;  %v278_v58 = vmul.f32 %v1309_v47, %v221_v26 }
  0x8c   :  { %v279_v23 = vmul.f32 %v1303_v43, %v225_v27  ;;  %v280_v26 = vmul.f32 %v1309_v47, %v225_v27 }
  0x8d   :  { %v309_v31 = vadd.f32 %v277_v56, %v163_v55  ;;  %v310_v33 = vadd.f32 %v278_v58, %v164_v57 }
  0x8e   :  { %v1287_v29 = vpop.permute.xlu0 %212  ;;  %v311_v50 = vadd.f32 %v279_v23, %v165_v21  ;;  %v312_v53 = vadd.f32 %v280_v26, %v166_v37 }
  0x8f   :  { %322 = vperm.xlu1 %932, %v1276_v18   ;;  %v273_v58 = vmul.f32 %v1303_v43, %v1287_v29  ;;  %v274_v60 = vmul.f32 %v1309_v47, %v1287_v29 }
  0x90   :  { %v375_v30 = vpop.permute.xlu1 %374 }
  0x91   :  { %v409_v20 = vadd.f32 %v375_v30, %v313_v59  ;;  %v410_v32 = vadd.f32 %v375_v30, %v314_v7 }
  0x92   :  { %v1295_v34 = vpop.permute.xlu0 %204 }
  0x93   :  { %943 = vtanh.f32 %v409_v20 }
  0x94   :  { %945 = vtanh.f32 %v410_v32 }
  0x95   :  { %v1299_v39 = vpop.permute.xlu1 %92 }
  0x96   :  { %v1301_v40 = vpop.permute.xlu0 %196  ;;  %v159_v61 = vmul.f32 %v1305_v44, %v1299_v39  ;;  %v160_v62 = vmul.f32 %v1311_v48, %v1299_v39 }
  0x98   :  { %v305_v23 = vadd.f32 %v273_v58, %v159_v61  ;;  %v306_v26 = vadd.f32 %v274_v60, %v160_v62  ;;  %v270_v60 = vmul.f32 %v1309_v47, %v1295_v34 }
  0x99   :  { %v98_v45 = vpop.permute.xlu1 %97 }
  0x9a   :  { %v1307_v46 = vpop.permute.xlu0 %188  ;;  %v161_v59 = vmul.f32 %v1305_v44, %v98_v45  ;;  %v162_v63 = vmul.f32 %v1311_v48, %v98_v45 }
  0x9e   :  { %v217_v51 = vpop.permute.xlu1 %216  ;;  %v1315_v52 = vpop.permute.xlu0 %180 }
  0x9f   :  { %v275_v24 = vmul.f32 %v1303_v43, %v217_v51  ;;  %v276_v57 = vmul.f32 %v1309_v47, %v217_v51 }
  0xa0   :  { %v1347_v32 = vpop.eup %943 }
  0xa1   :  { %v307_v51 = vadd.f32 %v275_v24, %v161_v59  ;;  %v308_v20 = vadd.f32 %v276_v57, %v162_v63 }
  0xa2   :  { %v1327_v1 = vpop.permute.xlu0 %172 }
  0xa3   :  { %v367_v19 = vpop.permute.xlu1 %366 }
  0xa4   :  { %v405_v22 = vadd.f32 %v367_v19, %v309_v31  ;;  %v406_v30 = vadd.f32 %v367_v19, %v310_v33 }
  0xa7   :  { %v379_v38 = vpop.permute.xlu0 %378 }
  0xa8   :  { %v411_v41 = vadd.f32 %v379_v38, %v315_v35  ;;  %v412_v42 = vadd.f32 %v379_v38, %v316_v36  ;;  %v1333_v49 = vpop.permute.xlu1 %82  ;;  %v1349_v35 = vpop.eup %945 }
  0xa9   :  { %v155_v61 = vmul.f32 %v1305_v44, %v1333_v49  ;;  %v156_v62 = vmul.f32 %v1311_v48, %v1333_v49 }
  0xaa   :  { %947 = vtanh.f32 %v411_v41 }
  0xab   :  { %949 = vtanh.f32 %v412_v42  ;;  %v371_v27 = vpop.permute.xlu0 %370 }
  0xac   :  { %951 = vtanh.f32 %v405_v22  ;;  %v407_v54 = vadd.f32 %v371_v27, %v311_v50  ;;  %v408_v55 = vadd.f32 %v371_v27, %v312_v53  ;;  %v88_v56 = vpop.permute.xlu1 %87 }
  0xad   :  { %953 = vtanh.f32 %v406_v30  ;;  %v157_v58 = vmul.f32 %v1305_v44, %v88_v56  ;;  %v158_v59 = vmul.f32 %v1311_v48, %v88_v56 }
  0xae   :  { %955 = vtanh.f32 %v407_v54  ;;  %v1096_v54 = vmov 3  }
  0xaf   :  { %957 = vtanh.f32 %v408_v55  ;;  %v363_v7 = vpop.permute.xlu0 %362  ;;  %933 = vset.pattern.permute.xlu0 %v1096_v54  ;;  %934 = vset.pattern.permute.xlu1 %v1096_v54 }
  0xb0   :  { %v403_v31 = vadd.f32 %v363_v7, %v307_v51  ;;  %v404_v33 = vadd.f32 %v363_v7, %v308_v20  ;;  %538 = vperm.xlu0 %933, %v1142_v3   ;;  %534 = vperm.xlu1 %934, %v1133_v0   ;;  %v269_v0 = vmul.f32 %v1303_v43, %v1295_v34 }
  0xb1   :  { %v209_v19 = vpop.permute.xlu1 %208 }
  0xb2   :  { %959 = vtanh.f32 %v403_v31  ;;  %v271_v55 = vmul.f32 %v1303_v43, %v209_v19  ;;  %v272_v57 = vmul.f32 %v1309_v47, %v209_v19  ;;  %v301_v31 = vadd.f32 %v269_v0, %v155_v61 }
  0xb3   :  { %961 = vtanh.f32 %v404_v33  ;;  %v355_v63 = vpop.permute.xlu0 %354  ;;  %v302_v33 = vadd.f32 %v270_v60, %v156_v62 }
  0xb4   :  { %526 = vperm.xlu0 %933, %v1149_v4   ;;  %530 = vperm.xlu1 %934, %v1156_v5   ;;  %v303_v3 = vadd.f32 %v271_v55, %v157_v58  ;;  %v304_v7 = vadd.f32 %v272_v57, %v158_v59 }
  0xb6   :  { %v359_v29 = vpop.permute.xlu1 %358  ;;  %v399_v34 = vadd.f32 %v355_v63, %v303_v3  ;;  %v400_v20 = vadd.f32 %v355_v63, %v304_v7 }
  0xb7   :  { %v1351_v36 = vpop.eup %947  ;;  %v401_v21 = vadd.f32 %v359_v29, %v305_v23  ;;  %v402_v37 = vadd.f32 %v359_v29, %v306_v26 }
  0xb8   :  { %v1353_v39 = vpop.eup %949  ;;  %v475_v45 = vpack.c.bf16 %v1351_v36, %v1347_v32  ;;  %518 = vperm.xlu0 %933, %v1168_v6   ;;  %522 = vperm.xlu1 %934, %v1190_v10  }
  0xb9   :  { %v1357_v38 = vpop.eup %951  ;;  %v476_v22 = vpack.c.bf16 %v1353_v39, %v1349_v35  ;;  %963 = vtanh.f32 %v401_v21 }
  0xba   :  { %v1361_v41 = vpop.eup %953  ;;  %965 = vtanh.f32 %v402_v37 }
  0xbb   :  { %v1363_v42 = vpop.eup %955  ;;  %589 = vmatprep.subr.bf16.mxu0 %v476_v22  ;;  %885 = vmatprep.subr.bf16.mxu1 %v476_v22  ;;  %v1365_v30 = vpop.permute.xlu1 %72  ;;  %967 = vtanh.f32 %v399_v34  ;;  %v265_v22 = vmul.f32 %v1303_v43, %v1301_v40  ;;  %v261_v34 = vmul.f32 %v1303_v43, %v1307_v46 }
  0xbc   :  { %v1367_v50 = vpop.eup %957  ;;  %590 = vmatpush1.bf16.msra.mxu0 %v475_v45  ;;  %893 = vmatpush1.bf16.msra.mxu1 %v475_v45  ;;  %v473_v53 = vpack.c.bf16 %v1363_v42, %v1357_v38  ;;  %969 = vtanh.f32 %v400_v20 }
  0xbd   :  { %v474_v27 = vpack.c.bf16 %v1367_v50, %v1361_v41  ;;  %510 = vperm.xlu0 %933, %v1175_v8   ;;  %514 = vperm.xlu1 %934, %v1222_v14  }
  0xbf   :  { %591 = vmatprep.subr.bf16.mxu0 %v474_v27  ;;  %886 = vmatprep.subr.bf16.mxu1 %v474_v27  ;;  %v78_v24 = vpop.permute.xlu1 %77  ;;  %v1389_v19 = vpop.eup %959 }
  0xc0   :  { %592 = vmatpush1.bf16.msra.mxu0 %v473_v53  ;;  %894 = vmatpush1.bf16.msra.mxu1 %v473_v53  ;;  %v1391_v4 = vpop.eup %961  ;;  %v153_v14 = vmul.f32 %v1305_v44, %v78_v24  ;;  %v154_v45 = vmul.f32 %v1311_v48, %v78_v24 }
  0xc1   :  { %502 = vperm.xlu0 %933, %v1182_v9   ;;  %506 = vperm.xlu1 %934, %v1235_v15   ;;  %v266_v9 = vmul.f32 %v1309_v47, %v1301_v40  ;;  %v152_v15 = vmul.f32 %v1311_v48, %v1365_v30 }
  0xc3   :  { %v298_v59 = vadd.f32 %v266_v9, %v152_v15 }
  0xc4   :  { %v201_v56 = vpop.permute.xlu1 %200 }
  0xc5   :  { %v267_v10 = vmul.f32 %v1303_v43, %v201_v56  ;;  %494 = vperm.xlu0 %933, %v1195_v11   ;;  %498 = vperm.xlu1 %934, %v1242_v16   ;;  %v268_v8 = vmul.f32 %v1309_v47, %v201_v56  ;;  %v151_v11 = vmul.f32 %v1305_v44, %v1365_v30  ;;  %v347_v16 = vpop.permute.xlu0 %346 }
  0xc6   :  { %v1395_v5 = vpop.eup %963 }
  0xc7   :  { %v1397_v51 = vpop.eup %965  ;;  %v471_v49 = vpack.c.bf16 %v1389_v19, %v1395_v5  ;;  %v299_v53 = vadd.f32 %v267_v10, %v153_v14  ;;  %v300_v27 = vadd.f32 %v268_v8, %v154_v45  ;;  %v297_v58 = vadd.f32 %v265_v22, %v151_v11 }
  0xc8   :  { %v472_v26 = vpack.c.bf16 %v1391_v4, %v1397_v51  ;;  %v1423_v55 = vpop.eup %967 }
  0xc9   :  { %v351_v23 = vpop.permute.xlu1 %350  ;;  %486 = vperm.xlu0 %933, %v1202_v12   ;;  %490 = vperm.xlu1 %934, %v1249_v17   ;;  %v1425_v24 = vpop.eup %969  ;;  %v395_v12 = vadd.f32 %v347_v16, %v299_v53  ;;  %v396_v40 = vadd.f32 %v347_v16, %v300_v27 }
  0xca   :  { %v397_v29 = vadd.f32 %v351_v23, %v301_v31  ;;  %v398_v21 = vadd.f32 %v351_v23, %v302_v33  ;;  %593 = vmatprep.subr.bf16.mxu0 %v472_v26  ;;  %887 = vmatprep.subr.bf16.mxu1 %v472_v26  ;;  %v262_v31 = vmul.f32 %v1309_v47, %v1307_v46  ;;  %v339_v23 = vpop.permute.xlu0 %338 }
  0xcb   :  { %594 = vmatpush1.bf16.msra.mxu0 %v471_v49  ;;  %895 = vmatpush1.bf16.msra.mxu1 %v471_v49 }
  0xcc   :  { %971 = vtanh.f32 %v397_v29 }
  0xcd   :  { %973 = vtanh.f32 %v398_v21  ;;  %478 = vperm.xlu0 %933, %v1210_v13   ;;  %482 = vperm.xlu1 %934, %v1276_v18  }
  0xce   :  { %v63_v6 = vpop.permute.xlu1 %62  ;;  %975 = vtanh.f32 %v395_v12 }
  0xcf   :  { %977 = vtanh.f32 %v396_v40  ;;  %v147_v33 = vmul.f32 %v1305_v44, %v63_v6  ;;  %v148_v49 = vmul.f32 %v1311_v48, %v63_v6 }
  0xd1   :  { %v293_v22 = vadd.f32 %v261_v34, %v147_v33  ;;  %v294_v53 = vadd.f32 %v262_v31, %v148_v49 }
  0xd2   :  { %v68_v37 = vpop.permute.xlu1 %67 }
  0xd3   :  { %v149_v7 = vmul.f32 %v1305_v44, %v68_v37  ;;  %v150_v56 = vmul.f32 %v1311_v48, %v68_v37 }
  0xd7   :  { %v193_v54 = vpop.permute.xlu1 %192 }
  0xd8   :  { %v263_v18 = vmul.f32 %v1303_v43, %v193_v54  ;;  %v264_v63 = vmul.f32 %v1309_v47, %v193_v54 }
  0xd9   :  { %v1427_v57 = vpop.eup %971 }
  0xda   :  { %1654 = vst [vmem:[#allocation7_spill] sm:$0xff] %v1427_v57  ;;  %v1431_v17 = vpop.eup %973  ;;  %v469_v30 = vpack.c.bf16 %v1423_v55, %v1427_v57  ;;  %v295_v20 = vadd.f32 %v263_v18, %v149_v7  ;;  %v296_v26 = vadd.f32 %v264_v63, %v150_v56  ;;  %v257_v7 = vmul.f32 %v1303_v43, %v1315_v52 }
  0xdb   :  { %1655 = vst [vmem:[#allocation8_spill] sm:$0xff] %v1431_v17  ;;  %v470_v3 = vpack.c.bf16 %v1425_v24, %v1431_v17  ;;  %v1447_v21 = vpop.eup %975  ;;  %v258_v56 = vmul.f32 %v1309_v47, %v1315_v52  ;;  %v253_v52 = vmul.f32 %v1303_v43, %v1327_v1 }
  0xdc   :  { %v343_v0 = vpop.permute.xlu1 %342  ;;  %1656 = vst [vmem:[#allocation9_spill] sm:$0xff] %v1447_v21  ;;  %v1449_v10 = vpop.eup %977  ;;  %v391_v37 = vadd.f32 %v339_v23, %v295_v20  ;;  %v392_v45 = vadd.f32 %v339_v23, %v296_v26 }
  0xdd   :  { %v393_v60 = vadd.f32 %v343_v0, %v297_v58  ;;  %v394_v61 = vadd.f32 %v343_v0, %v298_v59  ;;  %595 = vmatprep.subr.bf16.mxu0 %v470_v3  ;;  %888 = vmatprep.subr.bf16.mxu1 %v470_v3  ;;  %1657 = vst [vmem:[#allocation10_spill] sm:$0xff] %v1449_v10 }
  0xde   :  { %596 = vmatpush1.bf16.msra.mxu0 %v469_v30  ;;  %896 = vmatpush1.bf16.msra.mxu1 %v469_v30  ;;  %v331_v30 = vpop.permute.xlu0 %330 }
  0xdf   :  { %979 = vtanh.f32 %v393_v60 }
  0xe0   :  { %981 = vtanh.f32 %v394_v61 }
  0xe1   :  { %v53_v13 = vpop.permute.xlu1 %52  ;;  %983 = vtanh.f32 %v391_v37 }
  0xe2   :  { %985 = vtanh.f32 %v392_v45  ;;  %v143_v3 = vmul.f32 %v1305_v44, %v53_v13  ;;  %v144_v60 = vmul.f32 %v1311_v48, %v53_v13 }
  0xe4   :  { %v289_v13 = vadd.f32 %v257_v7, %v143_v3  ;;  %v290_v49 = vadd.f32 %v258_v56, %v144_v60 }
  0xe5   :  { %v58_v62 = vpop.permute.xlu1 %57 }
  0xe6   :  { %v145_v40 = vmul.f32 %v1305_v44, %v58_v62  ;;  %v146_v58 = vmul.f32 %v1311_v48, %v58_v62 }
  0xea   :  { %v185_v29 = vpop.permute.xlu1 %184 }
  0xeb   :  { %v259_v27 = vmul.f32 %v1303_v43, %v185_v29  ;;  %v260_v54 = vmul.f32 %v1309_v47, %v185_v29 }
  0xec   :  { %v1451_v8 = vpop.eup %979 }
  0xed   :  { %1658 = vst [vmem:[#allocation11_spill] sm:$0xff] %v1451_v8  ;;  %v1453_v14 = vpop.eup %981  ;;  %v467_v46 = vpack.c.bf16 %v1447_v21, %v1451_v8  ;;  %v291_v59 = vadd.f32 %v259_v27, %v145_v40  ;;  %v292_v0 = vadd.f32 %v260_v54, %v146_v58 }
  0xee   :  { %1659 = vst [vmem:[#allocation12_spill] sm:$0xff] %v1453_v14  ;;  %v468_v6 = vpack.c.bf16 %v1449_v10, %v1453_v14  ;;  %v1465_v18 = vpop.eup %983 }
  0xef   :  { %v335_v9 = vpop.permute.xlu1 %334  ;;  %1660 = vst [vmem:[#allocation13_spill] sm:$0xff] %v1465_v18  ;;  %v1467_v63 = vpop.eup %985  ;;  %v387_v34 = vadd.f32 %v331_v30, %v291_v59  ;;  %v388_v20 = vadd.f32 %v331_v30, %v292_v0 }
  0xf0   :  { %v389_v11 = vadd.f32 %v335_v9, %v293_v22  ;;  %v390_v15 = vadd.f32 %v335_v9, %v294_v53  ;;  %597 = vmatprep.subr.bf16.mxu0 %v468_v6  ;;  %889 = vmatprep.subr.bf16.mxu1 %v468_v6  ;;  %1661 = vst [vmem:[#allocation14_spill] sm:$0xff] %v1467_v63 }
  0xf1   :  { %598 = vmatpush1.bf16.msra.mxu0 %v467_v46  ;;  %897 = vmatpush1.bf16.msra.mxu1 %v467_v46  ;;  %v254_v53 = vmul.f32 %v1309_v47, %v1327_v1 }
  0xf2   :  { %987 = vtanh.f32 %v389_v11 }
  0xf3   :  { %989 = vtanh.f32 %v390_v15 }
  0xf4   :  { %v43_v16 = vpop.permute.xlu1 %42  ;;  %991 = vtanh.f32 %v387_v34 }
  0xf5   :  { %v139_v33 = vmul.f32 %v1305_v44, %v43_v16  ;;  %v140_v26 = vmul.f32 %v1311_v48, %v43_v16  ;;  %993 = vtanh.f32 %v388_v20 }
  0xf7   :  { %v285_v6 = vadd.f32 %v253_v52, %v139_v33  ;;  %v286_v15 = vadd.f32 %v254_v53, %v140_v26  ;;  %v935_v33 = vld [vmem:[%s1629_s2] sm:$0xff]   ;;  %v939_v26 = vld [vmem:[%s1629_s2 + $0x10] sm:$0xff]   ;;  %v942_v52 = vld [vmem:[%s1629_s2 + $0x38] sm:$0xff]  }
  0xf8   :  { %v48_v12 = vpop.permute.xlu1 %47 }
  0xf9   :  { %v141_v16 = vmul.f32 %v1305_v44, %v48_v12  ;;  %v142_v27 = vmul.f32 %v1311_v48, %v48_v12 }
  0xfd   :  { %v177_v61 = vpop.permute.xlu1 %176 }
  0xfe   :  { %v255_v46 = vmul.f32 %v1303_v43, %v177_v61  ;;  %v256_v9 = vmul.f32 %v1309_v47, %v177_v61 }
  0xff   :  { %v1473_v62 = vpop.eup %987 }
 0x100   :  { %1662 = vst [vmem:[#allocation15_spill] sm:$0xff] %v1473_v62  ;;  %v1475_v31 = vpop.eup %989  ;;  %v465_v23 = vpack.c.bf16 %v1465_v18, %v1473_v62  ;;  %v287_v40 = vadd.f32 %v255_v46, %v141_v16  ;;  %v288_v58 = vadd.f32 %v256_v9, %v142_v27 }
 0x101   :  { %1663 = vst [vmem:[#allocation16_spill] sm:$0xff] %v1475_v31  ;;  %v466_v37 = vpack.c.bf16 %v1467_v63, %v1475_v31  ;;  %v1491_v47 = vpop.eup %991 }
 0x102   :  { %v327_v29 = vpop.permute.xlu1 %326  ;;  %1664 = vst [vmem:[#allocation17_spill] sm:$0xff] %v1491_v47  ;;  %v1493_v0 = vpop.eup %993 }
 0x103   :  { %v385_v45 = vadd.f32 %v327_v29, %v289_v13  ;;  %v386_v22 = vadd.f32 %v327_v29, %v290_v49  ;;  %599 = vmatprep.subr.bf16.mxu0 %v466_v37  ;;  %890 = vmatprep.subr.bf16.mxu1 %v466_v37  ;;  %1665 = vst [vmem:[#allocation18_spill] sm:$0xff] %v1493_v0  ;;  %v936_v13 = vld [vmem:[%s1629_s2 + $0x20] sm:$0xff]   ;;  %v937_v49 = vld [vmem:[%s1629_s2 + $0x8] sm:$0xff]   ;;  %v940_v29 = vld [vmem:[%s1629_s2 + $0x30] sm:$0xff]  }
 0x104   :  { %600 = vmatpush1.bf16.msra.mxu0 %v465_v23  ;;  %898 = vmatpush1.bf16.msra.mxu1 %v465_v23  ;;  %v938_v23 = vld [vmem:[%s1629_s2 + $0x28] sm:$0xff]   ;;  %v941_v37 = vld [vmem:[%s1629_s2 + $0x18] sm:$0xff]  }
 0x105   :  { %995 = vtanh.f32 %v385_v45  ;;  %v1097_v45 = vmov 0.0  }
 0x106   :  { %997 = vtanh.f32 %v386_v22  ;;  %v319_v11 = vpop.permute.xlu1 %318 }
 0x107   :  { %v381_v54 = vadd.f32 %v319_v11, %v285_v6  ;;  %v382_v1 = vadd.f32 %v319_v11, %v286_v15 }
 0x109   :  { %999 = vtanh.f32 %v381_v54 }
 0x10a   :  { %v323_v59 = vpop.permute.xlu1 %322  ;;  %1001 = vtanh.f32 %v382_v1 }
 0x10b   :  { %v383_v43 = vadd.f32 %v323_v59, %v287_v40  ;;  %v384_v30 = vadd.f32 %v323_v59, %v288_v58 }
 0x10d   :  { %1003 = vtanh.f32 %v383_v43 }
 0x10e   :  { %1005 = vtanh.f32 %v384_v30 }
 0x112   :  { %v1495_v3 = vpop.eup %995 }
 0x113   :  { %1666 = vst [vmem:[#allocation19_spill] sm:$0xff] %v1495_v3  ;;  %v1497_v44 = vpop.eup %997  ;;  %v463_v48 = vpack.c.bf16 %v1491_v47, %v1495_v3 }
 0x114   :  { %1667 = vst [vmem:[#allocation20_spill] sm:$0xff] %v1497_v44  ;;  %v464_v12 = vpack.c.bf16 %v1493_v0, %v1497_v44 }
 0x116   :  { %601 = vmatprep.subr.bf16.mxu0 %v464_v12  ;;  %891 = vmatprep.subr.bf16.mxu1 %v464_v12  ;;  %v1503_v60 = vpop.eup %999 }
 0x117   :  { %602 = vmatpush1.bf16.msra.mxu0 %v463_v48  ;;  %899 = vmatpush1.bf16.msra.mxu1 %v463_v48  ;;  %1668 = vst [vmem:[#allocation21_spill] sm:$0xff] %v1503_v60  ;;  %v1505_v61 = vpop.eup %1001 }
 0x118   :  { %1669 = vst [vmem:[#allocation22_spill] sm:$0xff] %v1505_v61 }
 0x11a   :  { %v1507_v7 = vpop.eup %1003 }
 0x11b   :  { %1670 = vst [vmem:[#allocation23_spill] sm:$0xff] %v1507_v7  ;;  %v1509_v56 = vpop.eup %1005  ;;  %v461_v34 = vpack.c.bf16 %v1507_v7, %v1503_v60 }
 0x11c   :  { %1671 = vst [vmem:[#allocation24_spill] sm:$0xff] %v1509_v56  ;;  %v462_v20 = vpack.c.bf16 %v1509_v56, %v1505_v61 }
 0x11e   :  { %603 = vmatprep.subr.bf16.mxu0 %v462_v20  ;;  %892 = vmatprep.subr.bf16.mxu1 %v462_v20 }
 0x11f   :  { %604 = vmatpush1.bf16.msra.mxu0 %v461_v34  ;;  %900 = vmatpush1.bf16.msra.mxu1 %v461_v34 }
 0x122   :  { %622 = vmatmul.mubr.bf16.vlgmr.msra.gmra.mxu0 %v935_v33  ;;  %662 = vmatmul.mubr.bf16.vlgmr.msra.gmra.mxu1 %v936_v13 }
 0x123   :  { %631 = vmatprep.mubr.bf16.mxu0 %v1094_v2  ;;  %671 = vmatprep.mubr.bf16.mxu1 %v1094_v2 }
 0x12a   :  { %632 = vmatmul.mubr.bf16.gmra.mxu0 %v937_v49  ;;  %672 = vmatmul.mubr.bf16.gmra.mxu1 %v938_v23 }
 0x12b   :  { %641 = vmatprep.mubr.bf16.mxu0 %v1094_v2  ;;  %681 = vmatprep.mubr.bf16.mxu1 %v1094_v2  ;;  %v535_v40 = vpop.permute.xlu1 %534  ;;  %v539_v43 = vpop.permute.xlu0 %538 }
 0x12f   :  { %v531_v20 = vpop.permute.xlu1 %530  ;;  %v527_v49 = vpop.permute.xlu0 %526 }
 0x132   :  { %642 = vmatmul.mubr.bf16.gmra.mxu0 %v939_v26  ;;  %682 = vmatmul.mubr.bf16.gmra.mxu1 %v940_v29 }
 0x133   :  { %651 = vmatprep.mubr.bf16.mxu0 %v1094_v2  ;;  %691 = vmatprep.mubr.bf16.mxu1 %v1094_v2  ;;  %v519_v25 = vpop.permute.xlu0 %518 }
 0x138   :  { %v511_v62 = vpop.permute.xlu0 %510 }
 0x13a   :  { %652 = vmatmul.mubr.bf16.gmra.mxu0 %v941_v37  ;;  %692 = vmatmul.mubr.bf16.gmra.mxu1 %v942_v52  ;;  %v523_v37 = vpop.permute.xlu1 %522 }
 0x13b   :  { %833 = vmatprep.mubr.f32.mxu1 %v1097_v45 }
 0x13c   :  { %v503_v57 = vpop.permute.xlu0 %502 }
 0x13e   :  { %v515_v3 = vpop.permute.xlu1 %514 }
 0x142   :  { %v507_v21 = vpop.permute.xlu1 %506 }
 0x1e2   :  { %v1545_v22 = vpop.f32.mrf.mxu0  ;;  %v1547_v53 = vpop.f32.mrf.mxu1 }
 0x1e4   :  { %v1549_v46 = vpop.f32.mrf.mxu0  ;;  %v1551_v9 = vpop.f32.mrf.mxu1 }
 0x1e6   :  { %v1553_v2 = vpop.f32.mrf.mxu0  ;;  %v667_v6 = vpop.f32.mrf.mxu1 }
 0x1e8   :  { %v1555_v11 = vpop.f32.mrf.mxu0  ;;  %v669_v15 = vpop.f32.mrf.mxu1 }
 0x1ea   :  { %v1557_v16 = vpop.f32.mrf.mxu0  ;;  %v673_v27 = vpop.f32.mrf.mxu1 }
 0x1ec   :  { %v1559_v54 = vpop.f32.mrf.mxu0  ;;  %v675_v1 = vpop.f32.mrf.mxu1 }
 0x1ed   :  { %v676_v17 = vadd.f32 %v675_v1, %v519_v25 }
 0x1ee   :  { %v1561_v58 = vpop.f32.mrf.mxu0  ;;  %v677_v59 = vpop.f32.mrf.mxu1 }
 0x1f0   :  { %v1563_v30 = vpop.f32.mrf.mxu0  ;;  %v679_v48 = vpop.f32.mrf.mxu1 }
 0x1f1   :  { %v680_v10 = vadd.f32 %v679_v48, %v523_v37 }
 0x1f2   :  { %v1565_v12 = vpop.f32.mrf.mxu0  ;;  %v683_v34 = vpop.f32.mrf.mxu1 }
 0x1f3   :  { %v684_v14 = vadd.f32 %v683_v34, %v527_v49 }
 0x1f4   :  { %v1567_v33 = vpop.f32.mrf.mxu0  ;;  %v685_v13 = vpop.f32.mrf.mxu1 }
 0x1f5   :  { %v686_v8 = vadd.f32 %v685_v13, %v527_v49 }
 0x1f6   :  { %v687_v23 = vpop.f32.mrf.mxu1  ;;  %v1569_v26 = vpop.f32.mrf.mxu0 }
 0x1f7   :  { %v688_v18 = vadd.f32 %v687_v23, %v531_v20 }
 0x1f8   :  { %v689_v29 = vpop.f32.mrf.mxu1  ;;  %v649_v45 = vpop.f32.mrf.mxu0 }
 0x1f9   :  { %v690_v31 = vadd.f32 %v689_v29, %v531_v20 }
 0x1fa   :  { %v693_v52 = vpop.f32.mrf.mxu1  ;;  %v653_v7 = vpop.f32.mrf.mxu0 }
 0x1fb   :  { %v694_v47 = vadd.f32 %v693_v52, %v535_v40 }
 0x1fc   :  { %v695_v28 = vpop.f32.mrf.mxu1  ;;  %v655_v63 = vpop.f32.mrf.mxu0 }
 0x1fd   :  { %v696_v60 = vadd.f32 %v695_v28, %v535_v40  ;;  %v678_v28 = vadd.f32 %v677_v59, %v523_v37  ;;  %v670_v40 = vadd.f32 %v669_v15, %v515_v3 }
 0x1fe   :  { %v697_v61 = vpop.f32.mrf.mxu1 }
 0x1ff   :  { %v698_v56 = vadd.f32 %v697_v61, %v539_v43  ;;  %1007 = vtanh.f32 %v696_v60  ;;  %v657_v61 = vpop.f32.mrf.mxu0  ;;  %v668_v60 = vadd.f32 %v667_v6, %v515_v3  ;;  %v654_v3 = vadd.f32 %v653_v7, %v503_v57 }
 0x200   :  { %v699_v44 = vpop.f32.mrf.mxu1 }
 0x201   :  { %v700_v0 = vadd.f32 %v699_v44, %v539_v43  ;;  %1009 = vtanh.f32 %v698_v56  ;;  %v674_v44 = vadd.f32 %v673_v27, %v519_v25  ;;  %v659_v56 = vpop.f32.mrf.mxu0  ;;  %v499_v43 = vpop.permute.xlu1 %498 }
 0x202   :  { %v650_v27 = vadd.f32 %v649_v45, %v499_v43 }
 0x203   :  { %1011 = vtanh.f32 %v700_v0  ;;  %v666_v0 = vadd.f32 %v1551_v9, %v511_v62 }
 0x204   :  { %1013 = vtanh.f32 %v694_v47  ;;  %v664_v47 = vadd.f32 %v1547_v53, %v511_v62  ;;  %v648_v53 = vadd.f32 %v1569_v26, %v499_v43  ;;  %v1674_v43 = vld [vmem:[#allocation10_spill] sm:$0xff] }
 0x205   :  { %1015 = vtanh.f32 %v690_v31  ;;  %v495_v31 = vpop.permute.xlu0 %494  ;;  %v491_v15 = vpop.permute.xlu1 %490 }
 0x206   :  { %1017 = vtanh.f32 %v688_v18  ;;  %v660_v18 = vadd.f32 %v659_v56, %v507_v21  ;;  %v646_v48 = vadd.f32 %v1567_v33, %v495_v31  ;;  %v644_v7 = vadd.f32 %v1565_v12, %v495_v31 }
 0x207   :  { %1019 = vtanh.f32 %v686_v8  ;;  %v658_v8 = vadd.f32 %v657_v61, %v507_v21  ;;  %v640_v20 = vadd.f32 %v1563_v30, %v491_v15  ;;  %v638_v33 = vadd.f32 %v1561_v58, %v491_v15 }
 0x208   :  { %1021 = vtanh.f32 %v684_v14  ;;  %v656_v14 = vadd.f32 %v655_v63, %v503_v57 }
 0x209   :  { %1023 = vtanh.f32 %v680_v10  ;;  %v487_v21 = vpop.permute.xlu0 %486  ;;  %v483_v12 = vpop.permute.xlu1 %482 }
 0x20a   :  { %1025 = vtanh.f32 %v678_v28  ;;  %v636_v23 = vadd.f32 %v1559_v54, %v487_v21  ;;  %v634_v26 = vadd.f32 %v1557_v16, %v487_v21  ;;  %v630_v37 = vadd.f32 %v1555_v11, %v483_v12  ;;  %v1681_v21 = vld [vmem:[#allocation15_spill] sm:$0xff] }
 0x20b   :  { %1027 = vtanh.f32 %v676_v17  ;;  %v628_v52 = vadd.f32 %v1553_v2, %v483_v12 }
 0x20c   :  { %1029 = vtanh.f32 %v674_v44  ;;  %v1008_v59 = vpop.eup %1007 }
 0x20d   :  { %1031 = vtanh.f32 %v670_v40  ;;  %v763_v57 = vadd.f32 %v1008_v59, %v1349_v35  ;;  %v479_v29 = vpop.permute.xlu0 %478 }
 0x20e   :  { %1033 = vtanh.f32 %v668_v60  ;;  %v1010_v25 = vpop.eup %1009  ;;  %v626_v45 = vadd.f32 %v1549_v46, %v479_v29  ;;  %v624_v11 = vadd.f32 %v1545_v22, %v479_v29  ;;  %v1673_v60 = vld [vmem:[#allocation7_spill] sm:$0xff] }
 0x20f   :  { %1035 = vtanh.f32 %v666_v0  ;;  %v764_v9 = vadd.f32 %v1010_v25, %v1351_v36  ;;  %v1677_v25 = vld [vmem:[#allocation11_spill] sm:$0xff] }
 0x210   :  { %v1012_v10 = vpop.eup %1011  ;;  %1037 = vtanh.f32 %v664_v47  ;;  %v1675_v47 = vld [vmem:[#allocation9_spill] sm:$0xff] }
 0x211   :  { %v1014_v6 = vpop.eup %1013  ;;  %1039 = vtanh.f32 %v660_v18  ;;  %v765_v17 = vadd.f32 %v1012_v10, %v1353_v39 }
 0x212   :  { %v1016_v62 = vpop.eup %1015  ;;  %1041 = vtanh.f32 %v658_v8  ;;  %v762_v39 = vadd.f32 %v1014_v6, %v1347_v32 }
 0x213   :  { %v1018_v1 = vpop.eup %1017  ;;  %1043 = vtanh.f32 %v656_v14  ;;  %769 = vmatprep.subr.mxu1 %v765_v17  ;;  %v761_v36 = vadd.f32 %v1016_v62, %v1367_v50 }
 0x214   :  { %v1020_v63 = vpop.eup %1019  ;;  %1045 = vtanh.f32 %v654_v3  ;;  %770 = vmatpush1.msra.mxu1 %v764_v9  ;;  %v760_v35 = vadd.f32 %v1018_v1, %v1363_v42  ;;  %v1678_v3 = vld [vmem:[#allocation14_spill] sm:$0xff] }
 0x215   :  { %v1022_v34 = vpop.eup %1021  ;;  %1047 = vtanh.f32 %v650_v27  ;;  %771 = vmatprep.subr.mxu1 %v763_v57  ;;  %v759_v32 = vadd.f32 %v1020_v63, %v1361_v41  ;;  %v1679_v27 = vld [vmem:[#allocation13_spill] sm:$0xff]  ;;  %v1682_v63 = vld [vmem:[#allocation18_spill] sm:$0xff] }
 0x216   :  { %v1024_v13 = vpop.eup %1023  ;;  %1049 = vtanh.f32 %v648_v53  ;;  %772 = vmatpush1.msra.mxu1 %v762_v39  ;;  %v758_v50 = vadd.f32 %v1022_v34, %v1357_v38  ;;  %v1680_v53 = vld [vmem:[#allocation16_spill] sm:$0xff]  ;;  %v1683_v34 = vld [vmem:[#allocation17_spill] sm:$0xff] }
 0x217   :  { %v1026_v49 = vpop.eup %1025  ;;  %1051 = vtanh.f32 %v646_v48  ;;  %773 = vmatprep.subr.mxu1 %v761_v36  ;;  %v757_v42 = vadd.f32 %v1024_v13, %v1391_v4  ;;  %v1684_v13 = vld [vmem:[#allocation20_spill] sm:$0xff] }
 0x218   :  { %v1028_v30 = vpop.eup %1027  ;;  %1053 = vtanh.f32 %v644_v7  ;;  %774 = vmatpush1.msra.mxu1 %v760_v35  ;;  %v756_v41 = vadd.f32 %v1026_v49, %v1389_v19  ;;  %v1685_v49 = vld [vmem:[#allocation19_spill] sm:$0xff] }
 0x219   :  { %v1030_v58 = vpop.eup %1029  ;;  %1055 = vtanh.f32 %v640_v20  ;;  %775 = vmatprep.subr.mxu1 %v759_v32  ;;  %v755_v38 = vadd.f32 %v1028_v30, %v1397_v51  ;;  %v1672_v51 = vld [vmem:[#allocation8_spill] sm:$0xff] }
 0x21a   :  { %v1032_v54 = vpop.eup %1031  ;;  %1057 = vtanh.f32 %v638_v33  ;;  %776 = vmatpush1.msra.mxu1 %v758_v50  ;;  %v754_v4 = vadd.f32 %v1030_v58, %v1395_v5  ;;  %v1686_v32 = vld [vmem:[#allocation24_spill] sm:$0xff]  ;;  %v1688_v58 = vld [vmem:[#allocation22_spill] sm:$0xff] }
 0x21b   :  { %v1034_v16 = vpop.eup %1033  ;;  %1059 = vtanh.f32 %v636_v23  ;;  %777 = vmatprep.subr.mxu1 %v757_v42  ;;  %v753_v2 = vadd.f32 %v1032_v54, %v1425_v24  ;;  %v766_v54 = vld [vmem:[%s1630_s3] sm:$0x1]  ;;  %s1071_s3 = scalar_lea.vmem %s870_s20, 32 }
 0x21c   :  { %v1036_v28 = vpop.eup %1035  ;;  %1061 = vtanh.f32 %v634_v26  ;;  %778 = vmatpush1.msra.mxu1 %v756_v41  ;;  %v752_v46 = vadd.f32 %v1034_v16, %v1423_v55  ;;  %v1676_v55 = vld [vmem:[#allocation12_spill] sm:$0xff]  ;;  %v1687_v26 = vld [vmem:[#allocation23_spill] sm:$0xff]  ;;  %p1072_p0 = scmp.ne.s32.totalorder %s870_s20, %s1071_s3  ;;  %p1077_p2 = scmp.lt.s32.totalorder %s1071_s3, %s1071_s3 }
 0x21d   :  { %v1038_v61 = vpop.eup %1037  ;;  %1063 = vtanh.f32 %v630_v37  ;;  %779 = vmatprep.subr.mxu1 %v755_v38  ;;  %v751_v40 = vadd.f32 %v1036_v28, %v1672_v51  ;;  %v1689_v37 = vld [vmem:[#allocation21_spill] sm:$0xff] }
 0x21e   :  { %v1040_v19 = vpop.eup %1039  ;;  %1065 = vtanh.f32 %v628_v52  ;;  %780 = vmatpush1.msra.mxu1 %v754_v4  ;;  %v750_v5 = vadd.f32 %v1038_v61, %v1673_v60  ;;  %v1098_v52 = vmov 1966171168   ;;  %v1690_v61 = vld [vmem:[#allocation6_spill] sm:$0xff]  ;;  %p1078_p3 = por %p1077_p2, %p1076_p1 }
 0x21f   :  { %v1042_v44 = vpop.eup %1041  ;;  %1067 = vtanh.f32 %v626_v45  ;;  %781 = vmatprep.subr.mxu1 %v753_v2  ;;  %v749_v0 = vadd.f32 %v1040_v19, %v1674_v43  ;;  %v844_v41 = vunpack.c.l.s4 %v1098_v52  ;;  %v768_v45 = vstv %s1631_s4 }
 0x220   :  { %v1044_v22 = vpop.eup %1043  ;;  %1069 = vtanh.f32 %v624_v11  ;;  %782 = vmatpush1.msra.mxu1 %v752_v46  ;;  %v748_v31 = vadd.f32 %v1042_v44, %v1675_v47  ;;  %v1691_v44 = vlaneseq  ;;  %p1079_p4 = pnand %p1078_p3, %p1072_p0 }
 0x221   :  { %v1046_v56 = vpop.eup %1045  ;;  %783 = vmatprep.subr.mxu1 %v751_v40  ;;  %v747_v59 = vadd.f32 %v1044_v22, %v1676_v55  ;;  %v845_v16 = vunpack.c.0.s8 %v844_v41 }
 0x222   :  { %v1048_v24 = vpop.eup %1047  ;;  %784 = vmatpush1.msra.mxu1 %v750_v5  ;;  %v746_v14 = vadd.f32 %v1046_v56, %v1677_v25  ;;  %vm860_vm0 = vcmp.lt.s32.totalorder %v1691_v44, 256 }
 0x223   :  { %v1050_v18 = vpop.eup %1049  ;;  %785 = vmatprep.subr.mxu1 %v749_v0  ;;  %v745_v6 = vadd.f32 %v1048_v24, %v1678_v3  ;;  %v848_v2 = vsub.s32 %v845_v16, %v1690_v61 }
 0x224   :  { %v1052_v8 = vpop.eup %1051  ;;  %786 = vmatpush1.msra.mxu1 %v748_v31  ;;  %v744_v17 = vadd.f32 %v1050_v18, %v1679_v27 }
 0x225   :  { %v1054_v10 = vpop.eup %1053  ;;  %787 = vmatprep.subr.mxu1 %v747_v59  ;;  %v743_v9 = vadd.f32 %v1052_v8, %v1680_v53 }
 0x226   :  { %v1056_v15 = vpop.eup %1055  ;;  %788 = vmatpush1.msra.mxu1 %v746_v14  ;;  %v742_v48 = vadd.f32 %v1054_v10, %v1681_v21 }
 0x227   :  { %v1058_v62 = vpop.eup %1057  ;;  %789 = vmatprep.subr.mxu1 %v745_v6  ;;  %v741_v7 = vadd.f32 %v1056_v15, %v1682_v63 }
 0x228   :  { %v1060_v1 = vpop.eup %1059  ;;  %790 = vmatpush1.msra.mxu1 %v744_v17  ;;  %v740_v20 = vadd.f32 %v1058_v62, %v1683_v34 }
 0x229   :  { %v1062_v57 = vpop.eup %1061  ;;  %791 = vmatprep.subr.mxu1 %v743_v9  ;;  %v739_v33 = vadd.f32 %v1060_v1, %v1684_v13 }
 0x22a   :  { %v1064_v39 = vpop.eup %1063  ;;  %792 = vmatpush1.msra.mxu1 %v742_v48  ;;  %v738_v12 = vadd.f32 %v1062_v57, %v1685_v49 }
 0x22b   :  { %v1066_v36 = vpop.eup %1065  ;;  %793 = vmatprep.subr.mxu1 %v741_v7  ;;  %v737_v30 = vadd.f32 %v1064_v39, %v1686_v32 }
 0x22c   :  { %v1068_v35 = vpop.eup %1067  ;;  %794 = vmatpush1.msra.mxu1 %v740_v20  ;;  %v736_v50 = vadd.f32 %v1066_v36, %v1687_v26 }
 0x22d   :  { %v1070_v23 = vpop.eup %1069  ;;  %795 = vmatprep.subr.mxu1 %v739_v33  ;;  %v735_v29 = vadd.f32 %v1068_v35, %v1688_v58 }
 0x22e   :  { %796 = vmatpush1.msra.mxu1 %v738_v12  ;;  %v734_v42 = vadd.f32 %v1070_v23, %v1689_v37 }
 0x22f   :  { %797 = vmatprep.subr.mxu1 %v737_v30 }
 0x230   :  { %798 = vmatpush1.msra.mxu1 %v736_v50 }
 0x231   :  { %799 = vmatprep.subr.mxu1 %v735_v29 }
 0x232   :  { %800 = vmatpush1.msra.mxu1 %v734_v42 }
 0x233   :  { %834 = vmatmul.mubr.f32.vlgmr.msra.gmra.mxu1 %v766_v54 }
 0x2f3   :  { %v835_v38 = vpop.f32.mrf.mxu1 }
 0x2f4   :  { %v836_v11 = vadd.f32 %v835_v38, %v768_v45 }
 0x2f5   :  { %v837_v28 = vpop.f32.mrf.mxu1 }
 0x2f6   :  { %v838_v4 = vadd.f32 %v837_v28, %v768_v45 }
 0x2f8   :  { %v842_v19 = vcombine.low %v836_v11, %v838_v4 }
 0x2fa   :  { %v849_v46 = vrot.slane %v842_v19, %v848_v2 }
 0x2fc   :  { %v856_v51 = vrot.slane %v849_v46, %v848_v2 }
 0x2fe   :  { %862 = vst.msk [vmem:[#allocation3] sm:$0x3] %vm860_vm0, %v856_v51 }
 0x2ff   :  { %1082 = shalt.err (!%p1079_p4)
}
 0x300   :  { %872 = dma.vmem_to_hbm [thread:$0]  %s870_s20, 32, %s1632_s5, [#allocation4]  }
 0x301   :  { %1091 = dma.done.wait [#allocation4], 32  }
 0x302   :  { %1092 = vsyncadd [#allocation4], 4294967264 }
 0x303   :  { %876 = vsyncpa [#allocation4], 1 }

</bundles_post_ra>
